<compile_context>
chip_gen: v5e
topology: v5e:2x2
jax: 0.10.0
libtpu: 0.0.40
codegen_flags: <defaults>
</compile_context>

<pallas_src>
import math

import jax
import jax.numpy as jnp
from jax import lax
from jax.experimental import pallas as pl
from jax.experimental.pallas import tpu as pltpu


def _make_type_sheaf_kernel(num_node_types: int, act, chunk: int, n_chunks: int):
    """Kernel body; num_node_types, activation and chunking are compile-time closures."""
    nt = num_node_types

    def kernel(idx_ref, w_ref, b_ref, o_ref):
        # idx_ref : VMEM [3, TE] int32   rows = (src node type, dst node type, edge type)
        # w_ref   : VMEM [P, F] float32  Linear weight (torch [out, in] layout)
        # b_ref   : VMEM [P, 1] float32  Linear bias
        # o_ref   : VMEM [P, TE] float32 maps^T for this tile (lane-dense over edges)
        f = w_ref.shape[1]
        w = w_ref[...]
        b = b_ref[...]
        # Hoisted out of the chunk loop (JAX does not CSE broadcasts/iotas).
        iota_f = lax.broadcasted_iota(jnp.int32, (f, chunk), 0)          # [F, chunk]

        def chunk_body(c, carry):
            start = pl.multiple_of(c * chunk, 128)
            idx = idx_ref[:, pl.ds(start, chunk)]                        # [3, chunk]
            src = idx[0:1, :]
            dst = idx[1:2, :]
            et = idx[2:3, :]
            # One-hot feature matrix, transposed (features on sublanes, edges on lanes).
            # The three one-hot segments occupy disjoint row ranges, so OR == concat,
            # and a single cast replaces 3 casts + 2 f32 adds.
            feat_t = (
                (iota_f == src)                                           # rows [0, Nt)
                | (iota_f == (dst + nt))                                  # rows [Nt, 2Nt)
                | (iota_f == (et + 2 * nt))                               # rows [2Nt, F)
            ).astype(jnp.float32)                                         # [F, chunk]
            # Single MXU matmul + bias + activation, lane-dense over the edge axis.
            maps_t = jnp.dot(w, feat_t, preferred_element_type=jnp.float32) + b
            o_ref[:, pl.ds(start, chunk)] = act(maps_t).astype(o_ref.dtype)
            return carry

        lax.fori_loop(0, n_chunks, chunk_body, None, unroll=True)

    return kernel


def _choose_tile(e: int, te: int) -> int:
    """Pick the edge tile: multiple of 128, <= requested te, and (when there is enough
    work) small enough that the grid keeps >= 2 steps so v7x can use both TensorCores."""
    e128 = ((e + 127) // 128) * 128
    if e128 >= 2 * 128:
        half = max(128, (e128 // 2 // 128) * 128)
        te = min(te, half)
    return max(128, min(te, e128))


def _choose_chunk(te_eff: int) -> int:
    """Inner vreg-working-set chunk (divides te_eff, multiple of 128, <= 512)."""
    if te_eff <= 512:
        return te_eff
    for c in (512, 256, 128):
        if te_eff % c == 0:
            return c
    return 128


def type_sheaf_learner_forward(
    edge_index,
    edge_types,
    node_types,
    weight,
    bias,
    out_shape,
    *,
    num_node_types: int,
    num_edge_types: int,
    sheaf_act: str = "tanh",
    te: int = 1024,
):
    """edge_index: [2, E] int, edge_types: [E] int, node_types: [N] int,
    weight: [P, F] f32 (F = 2*num_node_types + num_edge_types), bias: [P] f32.
    Returns maps of shape [E, *out_shape] (P == prod(out_shape))."""
    p, f = weight.shape
    assert f == 2 * num_node_types + num_edge_types
    assert p == int(math.prod(out_shape))
    assert te % 128 == 0, "edge tile must be a multiple of 128 for lane-dense blocks"

    e = int(edge_index.shape[1])
    src = edge_index[0].astype(jnp.int32)
    dst = edge_index[1].astype(jnp.int32)
    node_types = node_types.astype(jnp.int32)
    et = edge_types.astype(jnp.int32)

    # torch.index_select equivalent: per-edge node types (tiny int gather, left to XLA).
    src_nt = node_types[src]
    dst_nt = node_types[dst]

    te_eff = _choose_tile(e, te)
    chunk = _choose_chunk(te_eff)
    n_chunks = te_eff // chunk
    e_pad = ((e + te_eff - 1) // te_eff) * te_eff
    n_tiles = e_pad // te_eff

    # Single stacked per-edge integer input -> one input DMA per grid step.
    # Padded columns use valid type 0 and are sliced off after the call.
    idx = jnp.stack([src_nt, dst_nt, et], axis=0)                 # [3, E]
    idx = jnp.pad(idx, ((0, 0), (0, e_pad - e)))                  # [3, e_pad]

    w = weight.astype(jnp.float32)                                # [P, F]
    b = bias.astype(jnp.float32).reshape(p, 1)                    # [P, 1]

    if sheaf_act == "tanh":
        act = jnp.tanh
    elif sheaf_act == "id":
        act = lambda v: v
    elif sheaf_act == "elu":
        act = lambda v: jnp.where(v > 0, v, jnp.expm1(v))
    else:
        raise ValueError(f"Unsupported act {sheaf_act}")

    kernel = _make_type_sheaf_kernel(num_node_types, act, chunk, n_chunks)

    out_t = pl.pallas_call(
        kernel,
        out_shape=jax.ShapeDtypeStruct((n_tiles, p, te_eff), jnp.float32),
        grid_spec=pltpu.PrefetchScalarGridSpec(
            num_scalar_prefetch=0,
            grid=(n_tiles,),
            in_specs=[
                pl.BlockSpec((3, te_eff), lambda i: (0, i)),      # stacked per-edge ints
                pl.BlockSpec((p, f), lambda i: (0, 0)),           # Linear weight (resident)
                pl.BlockSpec((p, 1), lambda i: (0, 0)),           # Linear bias   (resident)
            ],
            # Contiguous output block per grid step: one burst write-back instead of
            # P strided row segments.
            out_specs=pl.BlockSpec((pl.Squeezed(), p, te_eff), lambda i: (i, 0, 0)),
        ),
        compiler_params=pltpu.CompilerParams(
            dimension_semantics=("parallel",),
        ),
    )(idx, w, b)                                                  # [n_tiles, P, te_eff]

    # out_t[i, :, r] is the map of edge j = i*te_eff + r.  One layout change to meet the
    # module's [E, *out_shape] contract (see TODO(synk) above about skipping it).
    maps = out_t.transpose(0, 2, 1).reshape(e_pad, p)[:e]         # [E, P]
    return maps.reshape((e,) + tuple(out_shape))


def _reference_forward(
    edge_index, edge_types, node_types, weight, bias, out_shape,
    num_node_types, num_edge_types, sheaf_act="tanh",
):
    src, dst = edge_index[0], edge_index[1]
    node_oh = jax.nn.one_hot(node_types, num_node_types, dtype=jnp.float32)
    src_t = node_oh[src]
    dst_t = node_oh[dst]
    et_oh = jax.nn.one_hot(edge_types, num_edge_types, dtype=jnp.float32)
    x_cat = jnp.concatenate([src_t, dst_t, et_oh], axis=1)
    maps = x_cat @ weight.T + bias
    if sheaf_act == "tanh":
        maps = jnp.tanh(maps)
    elif sheaf_act == "elu":
        maps = jnp.where(maps > 0, maps, jnp.expm1(maps))
    return maps.reshape((edge_index.shape[1],) + tuple(out_shape))


if __name__ == "__main__":
    key = jax.random.PRNGKey(0)
    k_e, k_et, k_nt, k_w, k_b = jax.random.split(key, 5)

    N = 16                          # nodes
    num_node_types = 4
    num_edge_types = 12
    d = 2
    out_shape = (d, d)
    P = d * d
    F = 2 * num_node_types + num_edge_types   # 20 (what forward actually consumes)

    # Deterministic init of Linear(F -> P) with bias (torch [out, in] layout).
    bound = 1.0 / math.sqrt(F)
    weight = jax.random.uniform(k_w, (P, F), dtype=jnp.float32, minval=-bound, maxval=bound)
    bias = jax.random.uniform(k_b, (P,), dtype=jnp.float32, minval=-bound, maxval=bound)

    # Two edge counts: a small one (exercises padding + 128-wide tile, single chunk) and a
    # larger one (exercises the 1024-wide tile with the 2-chunk inner loop).
    for E in (300, 3000):
        ke1, ke2 = jax.random.split(jax.random.fold_in(k_e, E))
        edge_index = jax.random.randint(ke1, (2, E), 0, N, dtype=jnp.int32)
        edge_types = jax.random.randint(ke2, (E,), 0, num_edge_types, dtype=jnp.int32)
        node_types = jax.random.randint(k_nt, (N,), 0, num_node_types, dtype=jnp.int32)

        maps = type_sheaf_learner_forward(
            edge_index, edge_types, node_types, weight, bias, out_shape,
            num_node_types=num_node_types, num_edge_types=num_edge_types,
            sheaf_act="tanh",
        )
        maps = jax.block_until_ready(maps)

        ref = _reference_forward(
            edge_index, edge_types, node_types, weight, bias, out_shape,
            num_node_types, num_edge_types, "tanh",
        )
        assert maps.shape == (E, d, d)
        assert jnp.allclose(maps, ref, atol=1e-5, rtol=1e-5), f"mismatch at E={E}"

    print("KERNEL_OK")
</pallas_src>

<mosaic_0001>
module attributes {stable_mosaic.version = 11 : i64} {
  func.func @kernel(%arg0: i32, %arg1: memref<3x128xi32, #tpu.memory_space<vmem>>, %arg2: memref<4x20xf32, #tpu.memory_space<vmem>>, %arg3: memref<4x1xf32, #tpu.memory_space<vmem>>, %arg4: memref<1x4x128xf32, #tpu.memory_space<vmem>>) attributes {dimension_semantics = [#tpu.dimension_semantics<parallel>], iteration_bounds = array<i64: 3>, scalar_prefetch = 0 : i64, scratch_operands = 0 : i64, tpu.core_type = #tpu.core_type<tc>, window_params = [{transform_indices = @transform_0, window_bounds = array<i64: 3, 128>}, {pipeline_mode = #tpu.pipeline_mode<synchronous>, transform_indices = @transform_1, window_bounds = array<i64: 4, 20>}, {pipeline_mode = #tpu.pipeline_mode<synchronous>, transform_indices = @transform_2, window_bounds = array<i64: 4, 1>}, {transform_indices = @transform_3, window_bounds = array<i64: 1, 4, 128>}]} {
    %c0 = arith.constant 0 : index
    %c0_0 = arith.constant 0 : index
    %0 = vector.load %arg2[%c0, %c0_0] : memref<4x20xf32, #tpu.memory_space<vmem>>, vector<4x20xf32>
    %c0_1 = arith.constant 0 : index
    %c0_2 = arith.constant 0 : index
    %1 = vector.load %arg3[%c0_1, %c0_2] : memref<4x1xf32, #tpu.memory_space<vmem>>, vector<4x1xf32>
    %2 = tpu.iota {dimensions = array<i32: 0>} : vector<20x128xi32>
    %c0_i32 = arith.constant 0 : i32
    %c128_i32 = arith.constant 128 : i32
    %3 = arith.muli %c0_i32, %c128_i32 : i32
    %4 = tpu.assume_multiple %3, 128 : i32
    %c0_3 = arith.constant 0 : index
    %5 = arith.index_cast %4 : i32 to index
    %6 = vector.load %arg1[%c0_3, %5] : memref<3x128xi32, #tpu.memory_space<vmem>>, vector<3x128xi32>
    %7 = vector.extract_strided_slice %6 {offsets = [0, 0], sizes = [1, 128], strides = [1, 1]} : vector<3x128xi32> to vector<1x128xi32>
    %8 = vector.extract_strided_slice %6 {offsets = [1, 0], sizes = [1, 128], strides = [1, 1]} : vector<3x128xi32> to vector<1x128xi32>
    %9 = vector.extract_strided_slice %6 {offsets = [2, 0], sizes = [1, 128], strides = [1, 1]} : vector<3x128xi32> to vector<1x128xi32>
    %10 = vector.broadcast %7 : vector<1x128xi32> to vector<20x128xi32>
    %11 = arith.cmpi eq, %2, %10 : vector<20x128xi32>
    %c4_i32 = arith.constant 4 : i32
    %12 = vector.broadcast %c4_i32 : i32 to vector<1x128xi32>
    %13 = arith.addi %8, %12 : vector<1x128xi32>
    %14 = vector.broadcast %13 : vector<1x128xi32> to vector<20x128xi32>
    %15 = arith.cmpi eq, %2, %14 : vector<20x128xi32>
    %16 = arith.ori %11, %15 : vector<20x128xi1>
    %c8_i32 = arith.constant 8 : i32
    %17 = vector.broadcast %c8_i32 : i32 to vector<1x128xi32>
    %18 = arith.addi %9, %17 : vector<1x128xi32>
    %19 = vector.broadcast %18 : vector<1x128xi32> to vector<20x128xi32>
    %20 = arith.cmpi eq, %2, %19 : vector<20x128xi32>
    %21 = arith.ori %16, %20 : vector<20x128xi1>
    %22 = arith.extui %21 : vector<20x128xi1> to vector<20x128xi32>
    %23 = arith.sitofp %22 : vector<20x128xi32> to vector<20x128xf32>
    %cst = arith.constant dense<0.000000e+00> : vector<4x128xf32>
    %24 = tpu.matmul %0, %23, %cst {dimension_numbers = #tpu.dot_dimension_numbers<[1], [0], [0], [1], [0, 0, 1, 1], [], []>} : vector<4x20xf32>, vector<20x128xf32>, vector<4x128xf32> -> vector<4x128xf32>
    %25 = vector.broadcast %1 : vector<4x1xf32> to vector<4x128xf32>
    %26 = arith.addf %24, %25 : vector<4x128xf32>
    %27 = math.tanh %26 : vector<4x128xf32>
    %c0_4 = arith.constant 0 : index
    %c0_5 = arith.constant 0 : index
    %28 = arith.index_cast %4 : i32 to index
    %29 = vector.load %arg4[%c0_4, %c0_5, %28] : memref<1x4x128xf32, #tpu.memory_space<vmem>>, vector<1x4x128xf32>
    %30 = vector.shape_cast %29 : vector<1x4x128xf32> to vector<4x128xf32>
    %31 = vector.shape_cast %27 : vector<4x128xf32> to vector<1x4x128xf32>
    tpu.vector_store %arg4[%c0_4, %c0_5, %28], %31 {strides = array<i32>} : memref<1x4x128xf32, #tpu.memory_space<vmem>>, vector<1x4x128xf32>,
    %c1_i32 = arith.constant 1 : i32
    return
  }
  func.func @transform_0(%arg0: i32) -> (i32, i32) {
    %c0_i32 = arith.constant 0 : i32
    %c0_i32_0 = arith.constant 0 : i32
    return %c0_i32, %arg0 : i32, i32
  }
  func.func @transform_1(%arg0: i32) -> (i32, i32) {
    %c0_i32 = arith.constant 0 : i32
    %c0_i32_0 = arith.constant 0 : i32
    %c0_i32_1 = arith.constant 0 : i32
    return %c0_i32, %c0_i32_0 : i32, i32
  }
  func.func @transform_2(%arg0: i32) -> (i32, i32) {
    %c0_i32 = arith.constant 0 : i32
    %c0_i32_0 = arith.constant 0 : i32
    %c0_i32_1 = arith.constant 0 : i32
    return %c0_i32, %c0_i32_0 : i32, i32
  }
  func.func @transform_3(%arg0: i32) -> (i32, i32, i32) {
    %c0_i32 = arith.constant 0 : i32
    %c0_i32_0 = arith.constant 0 : i32
    %c0_i32_1 = arith.constant 0 : i32
    return %arg0, %c0_i32, %c0_i32_0 : i32, i32, i32
  }
}

</mosaic_0001>

<bundles_post_ra>
// kernel: tpu_custom_call.1
= control target key start
LH: loop header
LB: loop body
LE: loop exit
PB: predicated region body
PF: predicated region fallthrough
CT: control target
= control target key end

     0   :  { %8 = vsyncpa [#allocation3], 0  ;;  %s669_s0 = inlined_call_operand.hbm [shape: s32[3,384], index: 0, kind: input, shape index: {}]   ;;  %s670_s1 = inlined_call_operand.vmem [shape: f32[4,20], index: 1, kind: input, shape index: {}]   ;;  %s671_s2 = inlined_call_operand.vmem [shape: f32[4,1], index: 2, kind: input, shape index: {}]   ;;  %s672_s3 = inlined_call_operand.hbm [shape: f32[3,4,128], index: 3, kind: output, shape index: {}]  }
   0x1   :  { %10 = vsyncpa [#allocation3 + $0x1], 0 }
   0x2   :  { %11 = vsyncpa [#allocation4], 0 }
   0x3   :  { %13 = vsyncpa [#allocation4 + $0x1], 0  ;;  %s534_s12 = smov 0   ;;  %s536_s13 = smov 0  }
   0x4   :  { %s538_s14 = smov 0   ;;  %s540_s15 = smov 0  }
   0x5 LB: > { %s555_s16 = sadd.s32 4294967295, %s509_s15   ;;  %s342_s17 = sadd.s32 4294967294, %s509_s15   ;;  %s509_s15 = sphi %s540_s15, %s681_s15   ;;  %s505_s14 = sphi %s538_s14, %s680_s14   ;;  %s501_s13 = sphi %s536_s13, %s679_s13   ;;  %s497_s12 = sphi %s534_s12, %s678_s12  }
   0x6   : > { %s559_s18 = sadd.s32 1, %s509_s15   ;;  %s26_s19 = sadd.s32 1, %s505_s14 }
   0x7   : > { %s23_s20 = ssub.s32 %s509_s15, %s559_s18  ;;  %p33_p0 = scmp.ne.s32.totalorder %s505_s14, %s501_s13 }
   0x8   : > { %p24_p1 = scmp.eq.s32.totalorder %s23_s20, 0  ;;  %p34_p2 = scmp.eq.s32.totalorder %s509_s15, 0 }
   0x9   : > { %p39_p3 = scmp.ne.s32.totalorder %s501_s13, %s497_s12  ;;  %p40_p4 = scmp.eq.s32.totalorder %s555_s16, 0 }
   0xa   : > { %s571_s21 = scalar_select %p24_p1, %s505_s14, %s26_s19  }
   0xb   : > { %p573_p5 = por %p34_p2, %p33_p0  ;;  %p577_p6 = por %p40_p4, %p39_p3 }
   0xc   : > { %p105_p7 = scmp.eq.s32.totalorder %s555_s16, 2  ;;  %p111_p8 = scmp.eq.s32.totalorder %s342_s17, 2 }
   0xd   : > { %p373_p9 = scmp.lt.s32.totalorder %s509_s15, 3  ;;  %s137_s26 = sand.u32 1, %s505_s14  }
   0xe   : > { %p583_p10 = por %p105_p7, %p33_p0  ;;  %p587_p11 = por %p111_p8, %p39_p3 }
   0xf   : > { %s346_s27 = sshll.u32 %s509_s15, 2  ;;  %s345_s28 = sshll.u32 %s137_s26, 2 }
  0x10   : > { %s145_s4 = scalar_lea.hbm %s669_s0, %s346_s27  ;;  %s141_s6 = scalar_lea.vmem [#allocation2], %s345_s28 }
  0x11   : > { %s147_s5 = sshll.u32 %s145_s4, 4  ;;  %s149_s7 = sshll.u32 %s141_s6, 4  ;;  %s148_s5 = int_to_ptr.hbm [resolvable:$true] %s147_s5  ;;  %s150_s7 = int_to_ptr.vmem [resolvable:$true] %s149_s7 }
  0x12   : > { %p598_p12 = pnand %p373_p9, %p573_p5  ;;  %p347_p13 = scmp.ge.s32.totalorder %s509_s15, 1 }
  0x13   : > { %p154_p0 = scmp.lt.s32.totalorder %s509_s15, 4  ;;  %s138_s9 = scalar_lea.sflag [#allocation3], %s137_s26 }
  0x14   : > { %s413_s10 = sshra.s32 %s148_s5, 4  ;;  %p417_p2 = pneg %p598_p12  ;;  %s414_s10 = int_to_ptr.hbm [resolvable:$true] %s413_s10 }
  0x15   : > { %s415_s11 = scalar_lea.hbm %s414_s10, 4  ;;  %s420_s20 = scalar_lea.hbm %s669_s0, 12 }
  0x16   : > { %p416_p1 = scmp.ne.s32.totalorder %s414_s10, %s415_s11  ;;  %p421_p5 = scmp.lt.s32.totalorder %s414_s10, %s669_s0 }
  0x17   : > { %p422_p7 = scmp.lt.s32.totalorder %s420_s20, %s415_s11 }
  0x18   : > { %p418_p3 = pnand %p417_p2, %p416_p1 }
  0x19   : > { %p423_p8 = por %p422_p7, %p421_p5 }
  0x1a   : > { %p419_p4 = pneg %p418_p3 }
  0x1c   : > { %p424_p9 = pnand %p423_p8, %p419_p4 }
  0x1e   : > { %427 = shalt.err (!%p424_p9)
}
  0x1f   : > { %368 = dma.hbm_to_vmem [thread:$0]  (!%p598_p12), %s148_s5, 64, %s150_s7, %s138_s9  }
  0x20   : > { %p155_p1 = pnand %p347_p13, %p154_p0 }
  0x21   : > { %s619_s26 = sand.u32 (!%p155_p1), 1, %s501_s13  }
  0x22   : > { %158 = sbr.rel (%p155_p1) target bundleno = 193 (0xc1), region = 32  ;;  %s348_s28 = sshll.u32 (!%p155_p1), %s619_s26, 2 }
  0x23   : > { %s161_s29 = scalar_lea.sflag (!%p155_p1), [#allocation3], %s619_s26  ;;  %s164_s30 = scalar_lea.vmem (!%p155_p1), [#allocation2], %s348_s28 }
  0x27   : > { %488 = dma.done.wait (%p577_p6), %s161_s29, 64  }
  0x28   : > { %490 = vsyncadd (%p577_p6), %s161_s29, 4294967232  ;;  %v190_v0 = vlaneseq  ;;  %v511_v2 = vmov 0   ;;  %v194_v4 = vld [vmem:[%s164_s30] sm:$0x7]  ;;  %vm230_vm6 = vcmask 1043456   ;;  %v512_v12 = vmov 0.0  }
  0x29   : > { %410 = vset.pattern.permute.xlu0 %v511_v2  ;;  %v189_v5 = vld [vmem:[%s671_s2] sm:$0xf]  ;;  %v195_v6 = vperm.slane %v194_v4, 0  ;;  %v199_v7 = vadd.s32 4, %v194_v4  ;;  %v207_v8 = vadd.s32 8, %v194_v4  ;;  %v513_v14 = vmov 1.0  }
  0x2a   : > { %v191_v1 = vshrl.u32 %v190_v0, 7  ;;  %223 = vperm.xlu0 %410, %v189_v5   ;;  %v188_v15 = vld [vmem:[%s670_s1] sm:$0xf]  ;;  %s358_s7 = sshll.u32 %s555_s16, 2  ;;  %s187_s11 = scalar_lea.vmem [#allocation5], %s348_s28 }
  0x2b   : > { %v200_v10 = vperm.slane %v199_v7, 1  ;;  %v208_v11 = vperm.slane %v207_v8, 2  ;;  %s267_s10 = scalar_lea.hbm %s672_s3, %s358_s7  ;;  %s269_s17 = sshll.u32 %s187_s11, 4  ;;  %s270_s17 = int_to_ptr.vmem [resolvable:$true] %s269_s17 }
  0x2c   : > { %v193_v3 = vadd.s32 16, %v191_v1  ;;  %v192_v9 = vadd.s32 8, %v191_v1  ;;  %vm196_vm9 = vcmp.eq.s32.totalorder %v191_v1, %v195_v6  ;;  %s271_s19 = sshll.u32 %s267_s10, 4  ;;  %s257_s20 = scalar_lea.sflag [#allocation4], %s619_s26  ;;  %s272_s19 = int_to_ptr.hbm [resolvable:$true] %s271_s19 }
  0x2d   : > { %vm201_vm10 = vcmp.eq.s32.totalorder %v191_v1, %v200_v10  ;;  %vm209_vm12 = vcmp.eq.s32.totalorder %v191_v1, %v208_v11  ;;  %s457_s22 = sshra.s32 %s272_s19, 4  ;;  %s463_s30 = scalar_lea.hbm %s672_s3, 12  ;;  %s458_s22 = int_to_ptr.hbm [resolvable:$true] %s457_s22 }
  0x2e   : > { %vm198_vm0 = vcmp.eq.s32.totalorder %v193_v3, %v195_v6  ;;  %vm203_vm1 = vcmp.eq.s32.totalorder %v193_v3, %v200_v10  ;;  %vm211_vm2 = vcmp.eq.s32.totalorder %v193_v3, %v208_v11  ;;  %vm197_vm3 = vcmp.eq.s32.totalorder %v192_v9, %v195_v6  ;;  %vm204_vm14 = vmor %vm196_vm9, %vm201_vm10  ;;  %s459_s16 = scalar_lea.hbm %s458_s22, 4  ;;  %p464_p0 = scmp.lt.s32.totalorder %s458_s22, %s672_s3 }
  0x2f   : > { %vm202_vm4 = vcmp.eq.s32.totalorder %v192_v9, %v200_v10  ;;  %vm206_vm5 = vmor %vm198_vm0, %vm203_vm1  ;;  %vm210_vm7 = vcmp.eq.s32.totalorder %v192_v9, %v208_v11  ;;  %vm226_vm0 = vcmask 162816   ;;  %p460_p6 = scmp.ne.s32.totalorder %s458_s22, %s459_s16  ;;  %p465_p2 = scmp.lt.s32.totalorder %s463_s30, %s459_s16 }
  0x30   : > { %vm214_vm8 = vmor %vm206_vm5, %vm211_vm2 }
  0x31   : > { %v352_v13 = vsel %vm214_vm8, 1.0, %v512_v12  ;;  %vm205_vm11 = vmor %vm197_vm3, %vm202_vm4  ;;  %p461_p12 = pnand %p460_p6, %p583_p10  ;;  %p466_p3 = por %p465_p2, %p464_p0 }
  0x32   : > { %353 = vmatpush.msk.msra.mxu0 %vm230_vm6, %v352_v13  ;;  %vm213_vm13 = vmor %vm205_vm11, %vm210_vm7 }
  0x33   : > { %vm212_vm15 = vmor %vm204_vm14, %vm209_vm12  ;;  %p462_p13 = pneg %p461_p12 }
  0x34   : > { %354 = vmatpush.msk.msra.mxu0 %vm213_vm13, %v513_v14 }
  0x35   : > { %p467_p4 = pnand %p466_p3, %p462_p13 }
  0x36   : > { %355 = vmatpush.msk.msra.mxu0 %vm212_vm15, %v513_v14 }
  0x37   : > { %356 = vmatmul.msk.f32.vlgmr.msra.gmra.mxu0 %vm226_vm0, %v188_v15 }
  0x9c   : > { %v224_v16 = vpop.permute.xlu0 %223 }
  0xb4   : > { %v251_v17 = vpop.f32.mrf.mxu0 }
  0xb5   : > { %v252_v18 = vadd.f32 %v251_v17, %v224_v16 }
  0xb7   : > { %411 = vtanh.f32 %v252_v18 }
  0xbd   : > { %v412_v19 = vpop.eup %411 }
  0xbe   : > { %255 = vst [vmem:[%s187_s11] sm:$0xf] %v412_v19 }
  0xbf   : > { %470 = shalt.err (!%p467_p4)
}
  0xc0   : > { %363 = dma.vmem_to_hbm [thread:$0]  (%p583_p10), %s270_s17, 64, %s272_s19, %s257_s20  }
  0xc1 PF: > { %p374_p5 = scmp.ge.s32.totalorder %s509_s15, 2  ;;  %s283_s26 = sand.u32 1, %s497_s12  }
  0xc2   : > { %s284_s5 = scalar_lea.sflag [#allocation4], %s283_s26 }
  0xc3   : > { %p370_p7 = pnand %p374_p5, %p587_p11 }
  0xc5   : > { %p371_p8 = pneg %p370_p7 }
  0xc7   : > { %492 = dma.done.wait (%p371_p8), %s284_s5, 64  }
  0xc8   : > { %494 = vsyncadd (%p371_p8), %s284_s5, 4294967232  ;;  %p16_p9 = scmp.ge.s32.totalorder %s559_s18, 5   ;;  %s678_s12 = smov %s501_s13 }
  0xc9   : > { %s679_s13 = smov %s505_s14  ;;  %s680_s14 = smov %s571_s21 }
  0xca   : > { %s681_s15 = smov %s559_s18  ;;  %18 = sbr.rel (!%p16_p9) target bundleno = 5 (0x5), region = 77 }
  0xcf   :  { %290 = vsyncpa [#allocation3], 1 }
  0xd0   :  { %292 = vsyncpa [#allocation3 + $0x1], 1 }
  0xd1   :  { %293 = vsyncpa [#allocation4], 1 }
  0xd2   :  { %295 = vsyncpa [#allocation4 + $0x1], 1 }

</bundles_post_ra>
